<compile_context>
chip_gen: v5e
topology: v5e:2x2
jax: 0.10.0
libtpu: 0.0.40
codegen_flags: <defaults>
</compile_context>

<pallas_src>
import jax
import jax.numpy as jnp
from jax.experimental import pallas as pl
from jax.experimental.pallas import tpu as pltpu  # noqa: F401  (kept for clarity)


def _sigmoid(z):
    # exp -> EUP, approximate reciprocal -> EUP; keeps the VALU path minimal.
    return pl.reciprocal(1.0 + jnp.exp(-z), approx=True)


def _mlp_kernel(x_ref, w1_ref, w2t_ref, o_ref):
    # X @ W1 with inputSize == 1 is just a broadcast multiply:
    #   (B, 1) * (1, H) -> (B, H)        (pure VPU, no MXU)
    z = x_ref[...] * w1_ref[...]
    z2 = _sigmoid(z)
    # z2 @ W2 with outputSize == 1: multiply by W2^T (1, H) and reduce over
    # the hidden (lane) axis -> (B, 1).  Cross-lane reduce goes to the XLU.
    z3 = jnp.sum(z2 * w2t_ref[...], axis=-1, keepdims=True)
    o_ref[...] = _sigmoid(z3).astype(o_ref.dtype)


def neural_network_forward(x, w1, w2):
    """Fused forward pass: sigmoid(sigmoid(x @ w1) @ w2).

    x:  (B, 1) float32
    w1: (1, H) float32
    w2: (H, 1) float32   (transposed once in the wrapper; outputSize == 1)
    """
    B = x.shape[0]
    O = w2.shape[1]
    assert x.shape[1] == 1 and O == 1, "kernel specialized to inputSize=outputSize=1"
    w2t = w2.T  # (1, H) — trivial layout plumbing outside the kernel
    # No grid, no pipelining: full arrays land in VMEM as single blocks
    # (block == full array satisfies the (8,128) rule), total footprint < 1 KiB.
    return pl.pallas_call(
        _mlp_kernel,
        out_shape=jax.ShapeDtypeStruct((B, O), x.dtype),
    )(x, w1, w2t)


def reference_forward(x, w1, w2):
    z2 = 1.0 / (1.0 + jnp.exp(-(x @ w1)))
    return 1.0 / (1.0 + jnp.exp(-(z2 @ w2)))


if __name__ == "__main__":
    # Module sizes from __init__: inputSize=1, hiddenSize=3, outputSize=1.
    input_size, hidden_size, output_size = 1, 3, 1
    batch = 8

    key = jax.random.PRNGKey(0)
    kx, kw1, kw2 = jax.random.split(key, 3)

    # Deterministic "torch.randn"-style parameters.
    W1 = jax.random.normal(kw1, (input_size, hidden_size), dtype=jnp.float32)
    W2 = jax.random.normal(kw2, (hidden_size, output_size), dtype=jnp.float32)
    X = jax.random.normal(kx, (batch, input_size), dtype=jnp.float32)

    out = neural_network_forward(X, W1, W2)
    out = jax.block_until_ready(out)

    ref = reference_forward(X, W1, W2)
    assert out.shape == (batch, output_size)
    # Approx reciprocal on the EUP -> allow ~1e-3-level error.
    assert jnp.allclose(out, ref, atol=5e-3, rtol=5e-3), (out, ref)

    print("KERNEL_OK")
</pallas_src>

<mosaic_0001>
module attributes {stable_mosaic.version = 11 : i64} {
  func.func @_mlp_kernel(%arg0: memref<8x1xf32, #tpu.memory_space<vmem>>, %arg1: memref<1x3xf32, #tpu.memory_space<vmem>>, %arg2: memref<1x3xf32, #tpu.memory_space<vmem>>, %arg3: memref<8x1xf32, #tpu.memory_space<vmem>>) attributes {dimension_semantics = [], scalar_prefetch = 0 : i64, scratch_operands = 0 : i64, tpu.core_type = #tpu.core_type<tc>} {
    %c0 = arith.constant 0 : index
    %c0_0 = arith.constant 0 : index
    %0 = vector.load %arg0[%c0, %c0_0] : memref<8x1xf32, #tpu.memory_space<vmem>>, vector<8x1xf32>
    %c0_1 = arith.constant 0 : index
    %c0_2 = arith.constant 0 : index
    %1 = vector.load %arg1[%c0_1, %c0_2] : memref<1x3xf32, #tpu.memory_space<vmem>>, vector<1x3xf32>
    %2 = vector.broadcast %0 : vector<8x1xf32> to vector<8x3xf32>
    %3 = vector.broadcast %1 : vector<1x3xf32> to vector<8x3xf32>
    %4 = arith.mulf %2, %3 : vector<8x3xf32>
    %cst = arith.constant 0.000000e+00 : f32
    %5 = vector.broadcast %cst : f32 to vector<8x3xf32>
    %6 = arith.subf %5, %4 : vector<8x3xf32>
    %7 = math.exp %6 : vector<8x3xf32>
    %cst_3 = arith.constant 1.000000e+00 : f32
    %8 = vector.broadcast %cst_3 : f32 to vector<8x3xf32>
    %9 = arith.addf %8, %7 : vector<8x3xf32>
    %10 = tpu.reciprocal %9 {approx = true} : vector<8x3xf32> -> vector<8x3xf32>
    %c0_4 = arith.constant 0 : index
    %c0_5 = arith.constant 0 : index
    %11 = vector.load %arg2[%c0_4, %c0_5] : memref<1x3xf32, #tpu.memory_space<vmem>>, vector<1x3xf32>
    %12 = vector.broadcast %11 : vector<1x3xf32> to vector<8x3xf32>
    %13 = arith.mulf %10, %12 : vector<8x3xf32>
    %cst_6 = arith.constant dense<0.000000e+00> : vector<8xf32>
    %14 = vector.multi_reduction <add>, %13, %cst_6 [1] : vector<8x3xf32> to vector<8xf32>
    %15 = vector.shape_cast %14 : vector<8xf32> to vector<8x1xf32>
    %cst_7 = arith.constant 0.000000e+00 : f32
    %16 = vector.broadcast %cst_7 : f32 to vector<8x1xf32>
    %17 = arith.subf %16, %15 : vector<8x1xf32>
    %18 = math.exp %17 : vector<8x1xf32>
    %cst_8 = arith.constant 1.000000e+00 : f32
    %19 = vector.broadcast %cst_8 : f32 to vector<8x1xf32>
    %20 = arith.addf %19, %18 : vector<8x1xf32>
    %21 = tpu.reciprocal %20 {approx = true} : vector<8x1xf32> -> vector<8x1xf32>
    %c0_9 = arith.constant 0 : index
    %c0_10 = arith.constant 0 : index
    %22 = vector.load %arg3[%c0_9, %c0_10] : memref<8x1xf32, #tpu.memory_space<vmem>>, vector<8x1xf32>
    tpu.vector_store %arg3[%c0_9, %c0_10], %21 {strides = array<i32>} : memref<8x1xf32, #tpu.memory_space<vmem>>, vector<8x1xf32>,
    return
  }
}

</mosaic_0001>

<bundles_post_ra>
// kernel: tpu_custom_call.1
= control target key start
LH: loop header
LB: loop body
LE: loop exit
PB: predicated region body
PF: predicated region fallthrough
CT: control target
= control target key end

     0   :  { %v62_v0 = vmov 0   ;;  %vm35_vm0 = vcmask 23552   ;;  %vm44_vm1 = vcmask 7168   ;;  %s95_s0 = inlined_call_operand.vmem [shape: f32[8,1], index: 0, kind: input, shape index: {}]   ;;  %s96_s1 = inlined_call_operand.vmem [shape: f32[1,3], index: 1, kind: input, shape index: {}]   ;;  %s97_s2 = inlined_call_operand.vmem [shape: f32[1,3], index: 2, kind: input, shape index: {}]   ;;  %s98_s3 = inlined_call_operand.vmem [shape: f32[8,1], index: 3, kind: output, shape index: {}]  }
   0x1   :  { %51 = vset.pattern.permute.xlu0 %v62_v0  ;;  %v14_v1 = vld [vmem:[%s95_s0] sm:$0xff] }
   0x2   :  { %18 = vperm.xlu0 %51, %v14_v1   ;;  %v52_v2 = vld [vmem:[%s96_s1] ss:$0 sm:$0xff] }
   0x3   :  { %v53_v9 = vld [vmem:[%s97_s2] ss:$0 sm:$0xff] }
  0x74   :  { %v19_v3 = vpop.permute.xlu0 %18 }
  0x75   :  { %v24_v4 = vmul.f32 %v52_v2, %v19_v3 }
  0x77   :  { %v25_v5 = vsub.f32 0.0, %v24_v4 }
  0x79   :  { %v26_v6 = vmul.f32 1.442695, %v25_v5 }
  0x7b   :  { %54 = vpow2.f32 %v26_v6 }
  0x81   :  { %v55_v7 = vpop.eup %54 }
  0x82   :  { %v28_v8 = vadd.f32 1.0, %v55_v7 }
  0x84   :  { %56 = vrcp.f32 %v28_v8 }
  0x8a   :  { %v57_v10 = vpop.eup %56 }
  0x8b   :  { %v34_v11 = vmul.f32 %v57_v10, %v53_v9 }
  0x8d   :  { %v36_v12 = vsel %vm35_vm0, %v34_v11, 0.0 }
  0x8e   :  { %37 = vadd.xlane.f32.xlu0 %v36_v12 }
 0x101   :  { %v38_v13 = vpop.xlane.xlu0 %37 }
 0x102   :  { %v39_v14 = vsub.f32 0.0, %v38_v13 }
 0x104   :  { %v40_v15 = vmul.f32 1.442695, %v39_v14 }
 0x106   :  { %58 = vpow2.f32 %v40_v15 }
 0x10c   :  { %v59_v16 = vpop.eup %58 }
 0x10d   :  { %v42_v17 = vadd.f32 1.0, %v59_v16 }
 0x10f   :  { %60 = vrcp.f32 %v42_v17 }
 0x115   :  { %v61_v18 = vpop.eup %60 }
 0x116   :  { %45 = vst.msk [vmem:[%s98_s3] sm:$0xff] %vm44_vm1, %v61_v18 }

</bundles_post_ra>
